<compile_context>
chip_gen: v7x
topology: tpu7x:2x2x1
jax: 0.10.0
libtpu: 0.0.40
codegen_flags: <defaults>
</compile_context>

<pallas_src>
import functools

import jax
import jax.numpy as jnp
from jax.experimental import pallas as pl
from jax.experimental.pallas import tpu as pltpu


def _integer_range_kernel(x_ref, o_ref, *, block_rows, num_channels, max_value):
    # x_ref / o_ref: (block_rows, L) lane-dense tile of the flattened (N*C, H*W) view.
    r = jnp.round(x_ref[...])                 # round-half-to-even == torch.round
    dt = r.dtype

    # Channel of each row in this tile: global_row % C, shape (block_rows, 1).
    row0 = pl.program_id(0) * block_rows
    ch = (row0 + jax.lax.broadcasted_iota(jnp.int32, (block_rows, 1), 0)) % num_channels

    # Per-row clamp upper bound (only meaningful for channels 0 and 1).
    hi = jnp.where(ch == 0, jnp.asarray(float(max_value), dt), jnp.asarray(1.0, dt))
    clamped = jnp.clip(r, jnp.asarray(0.0, dt), hi)

    # Channels >= 2 are passed through as plain round(x).
    o_ref[...] = jnp.where(ch < 2, clamped, r).astype(o_ref.dtype)


def _choose_block_rows(num_rows, row_bytes, target_block_bytes=4 * 1024 * 1024):
    """Rows per block: ~target_block_bytes per buffer, multiple of 8 (or full extent)."""
    rows = max(1, target_block_bytes // max(1, row_bytes))
    if num_rows <= 8:
        return num_rows                       # block dim == full array dim: always legal
    rows = min(rows, num_rows)
    if rows < 8:
        return 8                              # very long rows: keep the (8, .) tiling legal
    return (rows // 8) * 8


def integer_range_output_layer(x, max_value=10):
    """x: float array of shape (N, C, H, W) with C >= 2 (NCHW layout)."""
    n, c, h, w = x.shape
    rows, cols = n * c, h * w
    x2 = x.reshape(rows, cols)                # zero-copy view of the contiguous NCHW array

    block_rows = _choose_block_rows(rows, cols * x2.dtype.itemsize)
    grid = (pl.cdiv(rows, block_rows),)

    kernel = functools.partial(
        _integer_range_kernel,
        block_rows=block_rows,
        num_channels=c,
        max_value=max_value,
    )

    out2 = pl.pallas_call(
        kernel,
        out_shape=jax.ShapeDtypeStruct((rows, cols), x2.dtype),
        grid_spec=pltpu.PrefetchScalarGridSpec(
            num_scalar_prefetch=0,
            grid=grid,
            in_specs=[pl.BlockSpec((block_rows, cols), lambda i: (i, 0))],
            out_specs=pl.BlockSpec((block_rows, cols), lambda i: (i, 0)),
        ),
        compiler_params=pltpu.CompilerParams(
            dimension_semantics=("parallel",),
            vmem_limit_bytes=32 * 1024 * 1024,   # headroom on v5e/v6e/v7x
        ),
        cost_estimate=pl.CostEstimate(
            flops=5 * x2.size, transcendentals=0, bytes_accessed=2 * x2.nbytes),
    )(x2)
    return out2.reshape(n, c, h, w)


def _reference(x, max_value=10):
    r = jnp.round(x)
    r = r.at[:, 0].set(jnp.clip(r[:, 0], 0.0, float(max_value)))
    r = r.at[:, 1].set(jnp.clip(r[:, 1], 0.0, 1.0))
    return r


if __name__ == "__main__":
    key = jax.random.PRNGKey(0)
    k1, k2 = jax.random.split(key)

    # Case 1: typical small NCHW input (batch=2, channels=4, spatial=16x16);
    # values span both clamp ranges (negatives, >max_value, >1).
    x1 = jax.random.uniform(k1, (2, 4, 16, 16), dtype=jnp.float32,
                            minval=-5.0, maxval=15.0)
    out1 = jax.block_until_ready(integer_range_output_layer(x1, max_value=10))
    ref1 = _reference(x1, max_value=10)
    assert out1.shape == ref1.shape and out1.dtype == ref1.dtype
    assert jnp.allclose(out1, ref1), "mismatch vs reference (case 1)"

    # Case 2: non-8/128-aligned flattened shape (rows=15, cols=960) to exercise
    # multi-step row tiling, partial edge block, and cross-block channel indexing.
    x2 = jax.random.uniform(k2, (3, 5, 24, 40), dtype=jnp.float32,
                            minval=-5.0, maxval=15.0)
    out2 = jax.block_until_ready(integer_range_output_layer(x2, max_value=10))
    ref2 = _reference(x2, max_value=10)
    assert out2.shape == ref2.shape and out2.dtype == ref2.dtype
    assert jnp.allclose(out2, ref2), "mismatch vs reference (case 2)"

    print("KERNEL_OK")
</pallas_src>

<mosaic_0001>
module attributes {stable_mosaic.version = 11 : i64} {
  func.func @_integer_range_kernel(%arg0: i32, %arg1: memref<8x256xf32, #tpu.memory_space<vmem>>, %arg2: memref<8x256xf32, #tpu.memory_space<vmem>>) attributes {dimension_semantics = [#tpu.dimension_semantics<parallel>], iteration_bounds = array<i64: 1>, scalar_prefetch = 0 : i64, scratch_operands = 0 : i64, tpu.core_type = #tpu.core_type<tc>, window_params = [{transform_indices = @transform_0, window_bounds = array<i64: 8, 256>}, {transform_indices = @transform_1, window_bounds = array<i64: 8, 256>}]} {
    %c0 = arith.constant 0 : index
    %c0_0 = arith.constant 0 : index
    %0 = vector.load %arg1[%c0, %c0_0] : memref<8x256xf32, #tpu.memory_space<vmem>>, vector<8x256xf32>
    %1 = math.roundeven %0 : vector<8x256xf32>
    %c8_i32 = arith.constant 8 : i32
    %2 = arith.muli %arg0, %c8_i32 : i32
    %3 = tpu.iota {dimensions = array<i32: 0>} : vector<8x1xi32>
    %4 = vector.broadcast %2 : i32 to vector<8x1xi32>
    %5 = arith.addi %4, %3 : vector<8x1xi32>
    %c4_i32 = arith.constant 4 : i32
    %c0_i32 = arith.constant 0 : i32
    %6 = arith.cmpi eq, %c4_i32, %c0_i32 : i32
    %c1_i32 = arith.constant 1 : i32
    %7 = arith.select %6, %c1_i32, %c4_i32 : i32
    %8 = vector.broadcast %7 : i32 to vector<8x1xi32>
    %9 = arith.remsi %5, %8 : vector<8x1xi32>
    %c0_i32_1 = arith.constant 0 : i32
    %10 = vector.broadcast %c0_i32_1 : i32 to vector<8x1xi32>
    %11 = arith.cmpi ne, %9, %10 : vector<8x1xi32>
    %c0_i32_2 = arith.constant 0 : i32
    %12 = vector.broadcast %c0_i32_2 : i32 to vector<8x1xi32>
    %13 = arith.cmpi slt, %9, %12 : vector<8x1xi32>
    %c0_i32_3 = arith.constant 0 : i32
    %14 = arith.cmpi slt, %7, %c0_i32_3 : i32
    %15 = vector.broadcast %14 : i1 to vector<8x1xi1>
    %16 = vector.broadcast %15 : vector<8x1xi1> to vector<8x1xi1>
    %17 = arith.xori %13, %16 : vector<8x1xi1>
    %18 = arith.andi %17, %11 : vector<8x1xi1>
    %19 = vector.broadcast %7 : i32 to vector<8x1xi32>
    %20 = arith.addi %9, %19 : vector<8x1xi32>
    %21 = arith.select %18, %20, %9 : vector<8x1xi1>, vector<8x1xi32>
    %c0_i32_4 = arith.constant 0 : i32
    %22 = vector.broadcast %c0_i32_4 : i32 to vector<8x1xi32>
    %23 = arith.cmpi eq, %21, %22 : vector<8x1xi32>
    %cst = arith.constant 1.000000e+01 : f32
    %cst_5 = arith.constant 1.000000e+00 : f32
    %24 = vector.broadcast %cst : f32 to vector<8x1xf32>
    %25 = vector.broadcast %cst_5 : f32 to vector<8x1xf32>
    %26 = arith.select %23, %24, %25 : vector<8x1xi1>, vector<8x1xf32>
    %cst_6 = arith.constant 0.000000e+00 : f32
    %27 = vector.broadcast %cst_6 : f32 to vector<8x256xf32>
    %28 = arith.maximumf %27, %1 : vector<8x256xf32>
    %29 = vector.broadcast %26 : vector<8x1xf32> to vector<8x256xf32>
    %30 = arith.minimumf %29, %28 : vector<8x256xf32>
    %c2_i32 = arith.constant 2 : i32
    %31 = vector.broadcast %c2_i32 : i32 to vector<8x1xi32>
    %32 = arith.cmpi slt, %21, %31 : vector<8x1xi32>
    %33 = vector.shape_cast %32 : vector<8x1xi1> to vector<8x1xi1>
    %34 = vector.broadcast %33 : vector<8x1xi1> to vector<8x256xi1>
    %35 = arith.select %34, %30, %1 : vector<8x256xi1>, vector<8x256xf32>
    %c0_7 = arith.constant 0 : index
    %c0_8 = arith.constant 0 : index
    %36 = vector.load %arg2[%c0_7, %c0_8] : memref<8x256xf32, #tpu.memory_space<vmem>>, vector<8x256xf32>
    tpu.vector_store %arg2[%c0_7, %c0_8], %35 {strides = array<i32>} : memref<8x256xf32, #tpu.memory_space<vmem>>, vector<8x256xf32>,
    return
  }
  func.func @transform_0(%arg0: i32) -> (i32, i32) {
    %c0_i32 = arith.constant 0 : i32
    %c0_i32_0 = arith.constant 0 : i32
    return %arg0, %c0_i32 : i32, i32
  }
  func.func @transform_1(%arg0: i32) -> (i32, i32) {
    %c0_i32 = arith.constant 0 : i32
    %c0_i32_0 = arith.constant 0 : i32
    return %arg0, %c0_i32 : i32, i32
  }
}

</mosaic_0001>

<bundles_post_ra>
// kernel: tpu_custom_call.1
= control target key start
LH: loop header
LB: loop body
LE: loop exit
PB: predicated region body
PF: predicated region fallthrough
CT: control target
= control target key end

     0   :  { %6 = vsyncpa [#allocation3], 0  ;;  %s160_s0 = inlined_call_operand.hbm [shape: f32[8,256], index: 0, kind: input, shape index: {}]   ;;  %s161_s1 = inlined_call_operand.hbm [shape: f32[8,256], index: 1, kind: output, shape index: {}]  }
   0x1   :  { %7 = vsyncpa [#allocation4], 0  ;;  %s123_s6 = smov [#allocation2]   ;;  %s75_s10 = scalar_lea.hbm %s160_s0, 256 }
   0x2   :  { %s14_s7 = sshll.u32 %s123_s6, 4  ;;  %p76_p0 = scmp.ne.s32.totalorder %s160_s0, %s75_s10  ;;  %s15_s7 = int_to_ptr.vmem [resolvable:$true] %s14_s7 }
   0x3   :  { %p79_p1 = scmp.lt.u32.totalorder %s75_s10, %s160_s0 }
   0x5   :  { %p81_p2 = pnand %p79_p1, %p76_p0 }
   0x7   :  { %84 = shalt.err (!%p81_p2)
}
   0x8   :  { %s85_s15 = scalar_lea.vmem %s15_s7, 256  ;;  %p90_p4 = scmp.lt.s32.totalorder %s15_s7, %s15_s7 }
   0x9   :  { %p86_p3 = scmp.ne.s32.totalorder %s15_s7, %s85_s15  ;;  %p91_p5 = scmp.lt.s32.totalorder %s85_s15, %s85_s15 }
   0xb   :  { %p92_p6 = por %p91_p5, %p90_p4 }
   0xd   :  { %p93_p7 = pnand %p92_p6, %p86_p3 }
   0xf   :  { %96 = shalt.err (!%p93_p7)
}
  0x10   :  { %17 = dma.hbm_to_vmem [thread:$0]  %s160_s0, 256, %s15_s7, [#allocation3]  }
  0x11   :  { %119 = dma.done.wait [#allocation3], 256  }
  0x12   :  { %120 = vsyncadd [#allocation3], 4294967040  ;;  %v26_v0 = vlaneseq  ;;  %v21_v3 = vld [vmem:[#allocation2] sm:$0xff]  ;;  %v22_v4 = vld [vmem:[#allocation2 + $0x8] sm:$0xff]  ;;  %v124_v7 = vmov 1.0   ;;  %s125_s18 = smov [#allocation5]  }
  0x13   :  { %v70_v5 = vround.rtne.f32 %v21_v3  ;;  %v71_v6 = vround.rtne.f32 %v22_v4  ;;  %s61_s19 = sshll.u32 %s125_s18, 4  ;;  %s62_s19 = int_to_ptr.vmem [resolvable:$true] %s61_s19 }
  0x14   :  { %v27_v1 = vshrl.u32 %v26_v0, 7  ;;  %s97_s0 = scalar_lea.vmem %s62_s19, 256  ;;  %p102_p9 = scmp.lt.s32.totalorder %s62_s19, %s62_s19 }
  0x15   :  { %v44_v9 = vmax.f32 %v70_v5, 0.0  ;;  %v45_v10 = vmax.f32 %v71_v6, 0.0  ;;  %p98_p8 = scmp.ne.s32.totalorder %s62_s19, %s97_s0  ;;  %p103_p10 = scmp.lt.s32.totalorder %s97_s0, %s97_s0 }
  0x16   :  { %v34_v2 = vand.u32 3, %v27_v1 }
  0x17   :  { %p104_p11 = por %p103_p10, %p102_p9 }
  0x18   :  { %vm42_vm0 = vcmp.eq.s32.totalorder %v34_v2, 0  ;;  %vm48_vm1 = vcmp.lt.s32.totalorder %v34_v2, 2 }
  0x19   :  { %v43_v8 = vsel %vm42_vm0, 10.0, %v124_v7  ;;  %p105_p12 = pnand %p104_p11, %p98_p8 }
  0x1a   :  { %v46_v11 = vmin.f32 %v43_v8, %v44_v9  ;;  %v47_v12 = vmin.f32 %v43_v8, %v45_v10 }
  0x1c   :  { %v51_v13 = vsel %vm48_vm1, %v46_v11, %v70_v5  ;;  %v52_v14 = vsel %vm48_vm1, %v47_v12, %v71_v6 }
  0x1d   :  { %53 = vst [vmem:[#allocation5] sm:$0xff] %v51_v13  ;;  %54 = vst [vmem:[#allocation5 + $0x8] sm:$0xff] %v52_v14 }
  0x1e   :  { %108 = shalt.err (!%p105_p12)
}
  0x1f   :  { %s109_s22 = scalar_lea.hbm %s161_s1, 256 }
  0x20   :  { %p110_p13 = scmp.ne.s32.totalorder %s161_s1, %s109_s22  ;;  %p113_p0 = scmp.lt.u32.totalorder %s109_s22, %s161_s1 }
  0x22   :  { %p115_p1 = pnand %p113_p0, %p110_p13 }
  0x24   :  { %118 = shalt.err (!%p115_p1)
}
  0x25   :  { %64 = dma.vmem_to_hbm [thread:$0]  %s62_s19, 256, %s161_s1, [#allocation4]  }
  0x26   :  { %121 = dma.done.wait [#allocation4], 256  }
  0x27   :  { %122 = vsyncadd [#allocation4], 4294967040 }
  0x28   :  { %68 = vsyncpa [#allocation3], 1 }
  0x29   :  { %69 = vsyncpa [#allocation4], 1 }

</bundles_post_ra>
